<compile_context>
chip_gen: v6e
topology: v6e:2x2x1
jax: 0.10.0
libtpu: 0.0.40
codegen_flags: <defaults>
</compile_context>

<pallas_src>
import functools
import math

import jax
import jax.numpy as jnp
from jax.experimental import pallas as pl
from jax.experimental.pallas import tpu as pltpu


# ---------------------------------------------------------------------------
# Kernel
# ---------------------------------------------------------------------------
def rmsnorm_kernel(x_ref, g_ref, b_ref, o_ref, *, eps, d_true):
    # x_ref: [TR, D_pad] activation row tile; g_ref/b_ref: [1, D_pad] resident.
    x = x_ref[...].astype(jnp.float32)                          # [TR, D_pad]
    # sum/d_true (not mean over D_pad) so zero padding lanes don't bias it.
    ms = jnp.sum(x * x, axis=-1, keepdims=True) * (1.0 / d_true)
    inv = jax.lax.rsqrt(ms + eps)                               # EUP rsqrt
    y = x * inv * g_ref[...] + b_ref[...]                       # scale + shift
    o_ref[...] = y.astype(o_ref.dtype)


# ---------------------------------------------------------------------------
# Tiling heuristics
# ---------------------------------------------------------------------------
def _sublane_multiple(dtype):
    # f32 -> 8 rows/sublane-tile, bf16 -> 16, int8/fp8 -> 32 (row packing).
    return 8 * max(1, 4 // jnp.dtype(dtype).itemsize)


def _vmem_limit_bytes():
    try:
        cap = int(getattr(pltpu.get_tpu_info(), "vmem_capacity_bytes", 128 << 20))
    except Exception:
        cap = 128 << 20
    # 64 MiB on v5e/v6e (128 MiB physical); ~48 MiB on v7x (64 MiB physical).
    return int(min(64 << 20, max(32 << 20, cap - (16 << 20))))


def _choose_tile_rows(n_rows, d_pad, itemsize, sub, target_resident_bytes=12 << 20):
    """Row tile sized on the f32 working set, a multiple of the sublane pack."""
    # Per grid step: 2x input tile + 2x output tile (double buffers) plus
    # ~3 f32 tile-sized temporaries (x_f32, x*x, y) inside the body.
    per_row = d_pad * (2 * itemsize + 2 * itemsize + 3 * 4)
    tr = max(sub, (target_resident_bytes // per_row) // sub * sub)
    return tr


# ---------------------------------------------------------------------------
# Wrapper
# ---------------------------------------------------------------------------
def rmsnorm(x, g, b, eps=1e-5, tile_rows=None):
    """RMSNorm over the last dim of x. g, b are 1-D [D] params (as in PyTorch)."""
    orig_shape = x.shape
    D = orig_shape[-1]
    N = math.prod(orig_shape[:-1]) if len(orig_shape) > 1 else 1

    # Lane-dense [N, D_pad] slab.
    x2d = x.reshape(N, D)
    g1 = jnp.asarray(g).reshape(D).astype(jnp.float32)
    b1 = jnp.asarray(b).reshape(D).astype(jnp.float32)

    D_pad = ((D + 127) // 128) * 128
    if D_pad != D:
        # Keep stores unmasked; reduction divides by the true D (see kernel).
        x2d = jnp.pad(x2d, ((0, 0), (0, D_pad - D)))
        g1 = jnp.pad(g1, (0, D_pad - D))
        b1 = jnp.pad(b1, (0, D_pad - D))
    g2d = g1.reshape(1, D_pad)
    b2d = b1.reshape(1, D_pad)

    sub = _sublane_multiple(x.dtype)
    if N <= sub:
        tr = N                                   # full-extent block: always legal
    else:
        if tile_rows is None:
            tr = _choose_tile_rows(N, D_pad, x.dtype.itemsize, sub)
        else:
            tr = max(sub, (int(tile_rows) // sub) * sub)
        tr = min(tr, (N // sub) * sub)           # largest aligned tile <= N
        if tr >= N:
            # Guarantee >=2 grid steps so v7x's second TensorCore gets work.
            tr = max(sub, ((N // 2) // sub) * sub)

    grid = (pl.cdiv(N, tr),)

    out = pl.pallas_call(
        functools.partial(rmsnorm_kernel, eps=eps, d_true=float(D)),
        out_shape=jax.ShapeDtypeStruct((N, D_pad), x.dtype),
        grid=grid,
        in_specs=[
            pl.BlockSpec((tr, D_pad), lambda i: (i, 0)),   # streaming activation
            pl.BlockSpec((1, D_pad), lambda i: (0, 0)),    # g: resident across steps
            pl.BlockSpec((1, D_pad), lambda i: (0, 0)),    # b: resident across steps
        ],
        out_specs=pl.BlockSpec((tr, D_pad), lambda i: (i, 0)),
        compiler_params=pltpu.CompilerParams(
            dimension_semantics=("parallel",),             # megacore-shardable
            vmem_limit_bytes=_vmem_limit_bytes(),
        ),
    )(x2d, g2d, b2d)

    if D_pad != D:
        out = out[:, :D]
    return out.reshape(orig_shape)


# ---------------------------------------------------------------------------
# Pure-JAX reference (matches the PyTorch forward exactly)
# ---------------------------------------------------------------------------
def rmsnorm_reference(x, g, b, eps=1e-5):
    xf = x.astype(jnp.float32)
    norm = jnp.mean(xf ** 2, axis=-1, keepdims=True)
    y = xf * jax.lax.rsqrt(norm + eps)
    return (y * g.astype(jnp.float32) + b.astype(jnp.float32)).astype(x.dtype)


# ---------------------------------------------------------------------------
if __name__ == "__main__":
    key = jax.random.PRNGKey(0)
    k1, k2, k3 = jax.random.split(key, 3)

    # 1) Small, lane-dense config: batch=2, seq=8, dmodel=128 (splits into 2 tiles).
    B, S, D = 2, 8, 128
    x = jax.random.normal(k1, (B, S, D), jnp.float32)
    g = 1.0 + 0.1 * jax.random.normal(k2, (D,), jnp.float32)
    b = 0.1 * jax.random.normal(k3, (D,), jnp.float32)
    out = jax.block_until_ready(rmsnorm(x, g, b))
    ref = rmsnorm_reference(x, g, b)
    assert out.shape == x.shape and out.dtype == x.dtype
    assert jnp.allclose(out, ref, atol=1e-5, rtol=1e-5), float(jnp.max(jnp.abs(out - ref)))

    # 2) N not a multiple of 8 -> ragged last row tile (masked store path).
    B2, S2, D2 = 3, 7, 128
    x2 = jax.random.normal(k1, (B2, S2, D2), jnp.float32)
    g2 = 1.0 + 0.1 * jax.random.normal(k2, (D2,), jnp.float32)
    b2 = 0.1 * jax.random.normal(k3, (D2,), jnp.float32)
    out2 = jax.block_until_ready(rmsnorm(x2, g2, b2))
    ref2 = rmsnorm_reference(x2, g2, b2)
    assert jnp.allclose(out2, ref2, atol=1e-5, rtol=1e-5), float(jnp.max(jnp.abs(out2 - ref2)))

    # 3) D not a multiple of 128 -> padded-lane path with sum/D_true reduction.
    B3, S3, D3 = 2, 8, 96
    x3 = jax.random.normal(k1, (B3, S3, D3), jnp.float32)
    g3 = 1.0 + 0.1 * jax.random.normal(k2, (D3,), jnp.float32)
    b3 = 0.1 * jax.random.normal(k3, (D3,), jnp.float32)
    out3 = jax.block_until_ready(rmsnorm(x3, g3, b3))
    ref3 = rmsnorm_reference(x3, g3, b3)
    assert jnp.allclose(out3, ref3, atol=1e-5, rtol=1e-5), float(jnp.max(jnp.abs(out3 - ref3)))

    # 4) bf16 input: dtype-aware sublane rounding (16) + f32 internal math.
    B4, S4, D4 = 2, 64, 256
    x4 = jax.random.normal(k1, (B4, S4, D4), jnp.float32).astype(jnp.bfloat16)
    g4 = (1.0 + 0.1 * jax.random.normal(k2, (D4,), jnp.float32))
    b4 = 0.1 * jax.random.normal(k3, (D4,), jnp.float32)
    out4 = jax.block_until_ready(rmsnorm(x4, g4, b4))
    ref4 = rmsnorm_reference(x4, g4, b4)
    assert out4.dtype == jnp.bfloat16
    assert jnp.allclose(out4.astype(jnp.float32), ref4.astype(jnp.float32),
                        atol=1e-2, rtol=1e-2)

    # 5) Multi-step tiling with an explicit tile_rows override.
    B5, S5, D5 = 4, 512, 128
    x5 = jax.random.normal(k1, (B5, S5, D5), jnp.float32)
    g5 = 1.0 + 0.1 * jax.random.normal(k2, (D5,), jnp.float32)
    b5 = 0.1 * jax.random.normal(k3, (D5,), jnp.float32)
    out5 = jax.block_until_ready(rmsnorm(x5, g5, b5, tile_rows=256))
    ref5 = rmsnorm_reference(x5, g5, b5)
    assert jnp.allclose(out5, ref5, atol=1e-5, rtol=1e-5), float(jnp.max(jnp.abs(out5 - ref5)))

    print("KERNEL_OK")
</pallas_src>

<mosaic_0001>
module attributes {stable_mosaic.version = 11 : i64} {
  func.func @rmsnorm_kernel(%arg0: i32, %arg1: memref<8x128xf32, #tpu.memory_space<vmem>>, %arg2: memref<1x128xf32, #tpu.memory_space<vmem>>, %arg3: memref<1x128xf32, #tpu.memory_space<vmem>>, %arg4: memref<8x128xf32, #tpu.memory_space<vmem>>) attributes {dimension_semantics = [#tpu.dimension_semantics<parallel>], iteration_bounds = array<i64: 2>, scalar_prefetch = 0 : i64, scratch_operands = 0 : i64, tpu.core_type = #tpu.core_type<tc>, window_params = [{transform_indices = @transform_0, window_bounds = array<i64: 8, 128>}, {pipeline_mode = #tpu.pipeline_mode<synchronous>, transform_indices = @transform_1, window_bounds = array<i64: 1, 128>}, {pipeline_mode = #tpu.pipeline_mode<synchronous>, transform_indices = @transform_2, window_bounds = array<i64: 1, 128>}, {transform_indices = @transform_3, window_bounds = array<i64: 8, 128>}]} {
    %c0 = arith.constant 0 : index
    %c0_0 = arith.constant 0 : index
    %0 = vector.load %arg1[%c0, %c0_0] : memref<8x128xf32, #tpu.memory_space<vmem>>, vector<8x128xf32>
    %1 = arith.mulf %0, %0 : vector<8x128xf32>
    %cst = arith.constant dense<0.000000e+00> : vector<8xf32>
    %2 = vector.multi_reduction <add>, %1, %cst [1] : vector<8x128xf32> to vector<8xf32>
    %3 = vector.shape_cast %2 : vector<8xf32> to vector<8x1xf32>
    %cst_1 = arith.constant 7.812500e-03 : f32
    %4 = vector.broadcast %cst_1 : f32 to vector<8x1xf32>
    %5 = arith.mulf %3, %4 : vector<8x1xf32>
    %cst_2 = arith.constant 9.99999974E-6 : f32
    %6 = vector.broadcast %cst_2 : f32 to vector<8x1xf32>
    %7 = arith.addf %5, %6 : vector<8x1xf32>
    %8 = math.rsqrt %7 : vector<8x1xf32>
    %9 = vector.broadcast %8 : vector<8x1xf32> to vector<8x128xf32>
    %10 = arith.mulf %0, %9 : vector<8x128xf32>
    %c0_3 = arith.constant 0 : index
    %c0_4 = arith.constant 0 : index
    %11 = vector.load %arg2[%c0_3, %c0_4] : memref<1x128xf32, #tpu.memory_space<vmem>>, vector<1x128xf32>
    %12 = vector.broadcast %11 : vector<1x128xf32> to vector<8x128xf32>
    %13 = arith.mulf %10, %12 : vector<8x128xf32>
    %c0_5 = arith.constant 0 : index
    %c0_6 = arith.constant 0 : index
    %14 = vector.load %arg3[%c0_5, %c0_6] : memref<1x128xf32, #tpu.memory_space<vmem>>, vector<1x128xf32>
    %15 = vector.broadcast %14 : vector<1x128xf32> to vector<8x128xf32>
    %16 = arith.addf %13, %15 : vector<8x128xf32>
    %c0_7 = arith.constant 0 : index
    %c0_8 = arith.constant 0 : index
    %17 = vector.load %arg4[%c0_7, %c0_8] : memref<8x128xf32, #tpu.memory_space<vmem>>, vector<8x128xf32>
    tpu.vector_store %arg4[%c0_7, %c0_8], %16 {strides = array<i32>} : memref<8x128xf32, #tpu.memory_space<vmem>>, vector<8x128xf32>,
    return
  }
  func.func @transform_0(%arg0: i32) -> (i32, i32) {
    %c0_i32 = arith.constant 0 : i32
    %c0_i32_0 = arith.constant 0 : i32
    return %arg0, %c0_i32 : i32, i32
  }
  func.func @transform_1(%arg0: i32) -> (i32, i32) {
    %c0_i32 = arith.constant 0 : i32
    %c0_i32_0 = arith.constant 0 : i32
    %c0_i32_1 = arith.constant 0 : i32
    return %c0_i32, %c0_i32_0 : i32, i32
  }
  func.func @transform_2(%arg0: i32) -> (i32, i32) {
    %c0_i32 = arith.constant 0 : i32
    %c0_i32_0 = arith.constant 0 : i32
    %c0_i32_1 = arith.constant 0 : i32
    return %c0_i32, %c0_i32_0 : i32, i32
  }
  func.func @transform_3(%arg0: i32) -> (i32, i32) {
    %c0_i32 = arith.constant 0 : i32
    %c0_i32_0 = arith.constant 0 : i32
    return %arg0, %c0_i32 : i32, i32
  }
}

</mosaic_0001>

<bundles_post_ra>
// kernel: tpu_custom_call.1
= control target key start
LH: loop header
LB: loop body
LE: loop exit
PB: predicated region body
PF: predicated region fallthrough
CT: control target
= control target key end

     0   :  { %8 = vsyncpa [#allocation3], 0  ;;  %s620_s0 = inlined_call_operand.hbm [shape: f32[16,128], index: 0, kind: input, shape index: {}]   ;;  %s621_s1 = inlined_call_operand.vmem [shape: f32[1,128], index: 1, kind: input, shape index: {}]   ;;  %s622_s2 = inlined_call_operand.vmem [shape: f32[1,128], index: 2, kind: input, shape index: {}]   ;;  %s623_s3 = inlined_call_operand.hbm [shape: f32[16,128], index: 3, kind: output, shape index: {}]  }
   0x1   :  { %10 = vsyncpa [#allocation3 + $0x1], 0 }
   0x2   :  { %11 = vsyncpa [#allocation4], 0 }
   0x3   :  { %13 = vsyncpa [#allocation4 + $0x1], 0  ;;  %s473_s12 = smov 0   ;;  %s475_s13 = smov 0  }
   0x4   :  { %s477_s14 = smov 0   ;;  %s479_s15 = smov 0  }
   0x5 LB: > { %s494_s16 = sadd.s32 4294967295, %s449_s15   ;;  %s295_s17 = sadd.s32 4294967294, %s449_s15   ;;  %s449_s15 = sphi %s479_s15, %s640_s15   ;;  %s445_s14 = sphi %s477_s14, %s639_s14   ;;  %s441_s13 = sphi %s475_s13, %s638_s13   ;;  %s437_s12 = sphi %s473_s12, %s637_s12  }
   0x6   : > { %s498_s18 = sadd.s32 1, %s449_s15   ;;  %s26_s19 = sadd.s32 1, %s445_s14 }
   0x7   : > { %s23_s20 = ssub.s32 %s449_s15, %s498_s18  ;;  %p33_p0 = scmp.ne.s32.totalorder %s445_s14, %s441_s13 }
   0x8   : > { %p24_p1 = scmp.eq.s32.totalorder %s23_s20, 0  ;;  %p34_p2 = scmp.eq.s32.totalorder %s449_s15, 0 }
   0x9   : > { %p39_p3 = scmp.ne.s32.totalorder %s441_s13, %s437_s12  ;;  %p40_p4 = scmp.eq.s32.totalorder %s494_s16, 0 }
   0xa   : > { %s510_s21 = scalar_select %p24_p1, %s445_s14, %s26_s19  }
   0xb   : > { %p512_p5 = por %p34_p2, %p33_p0  ;;  %p516_p6 = por %p40_p4, %p39_p3 }
   0xc   : > { %p105_p7 = scmp.eq.s32.totalorder %s494_s16, 1  ;;  %p111_p8 = scmp.eq.s32.totalorder %s295_s17, 1 }
   0xd   : > { %s627_s23 = scalar_select %p516_p6, 1, 0 }
   0xe   : > { %p321_p10 = scmp.lt.s32.totalorder %s449_s15, 2  ;;  %p523_p11 = por %p105_p7, %p33_p0 }
   0xf   : > { %p527_p12 = por %p111_p8, %p39_p3  ;;  %s137_s26 = sand.u32 1, %s445_s14  }
  0x10   : > { %s628_s24 = scalar_select %p523_p11, 1, 0 }
  0x11   : > { %s629_s25 = scalar_select %p527_p12, 1, 0 }
  0x12   : > { %s299_s27 = sshll.u32 %s449_s15, 7  ;;  %s298_s28 = sshll.u32 %s137_s26, 3 }
  0x13   : > { %s536_s4 = scalar_lea.hbm %s620_s0, %s299_s27  ;;  %s141_s5 = scalar_lea.vmem [#allocation2], %s298_s28 }
  0x14   : > { %s148_s6 = sshll.u32 %s141_s5, 4  ;;  %p540_p13 = pnand %p321_p10, %p512_p5  ;;  %s544_s6 = int_to_ptr.vmem [resolvable:$true] %s148_s6 }
  0x15   : > { %s138_s8 = scalar_lea.sflag [#allocation3], %s137_s26  ;;  %s357_s9 = scalar_lea.hbm %s536_s4, 128 }
  0x16   : > { %p358_p2 = scmp.ne.s32.totalorder %s536_s4, %s357_s9  ;;  %p359_p3 = pneg %p540_p13 }
  0x17   : > { %s362_s17 = scalar_lea.hbm %s620_s0, 256  ;;  %p363_p5 = scmp.lt.s32.totalorder %s536_s4, %s620_s0 }
  0x18   : > { %p360_p4 = pnand %p359_p3, %p358_p2  ;;  %p364_p8 = scmp.lt.s32.totalorder %s362_s17, %s357_s9 }
  0x1a   : > { %p361_p7 = pneg %p360_p4  ;;  %p365_p10 = por %p364_p8, %p363_p5 }
  0x1c   : > { %p366_p9 = pnand %p365_p10, %p361_p7 }
  0x1e   : > { %369 = shalt.err (!%p366_p9)
}
  0x1f   : > { %s370_s22 = scalar_lea.vmem %s544_s6, 128  ;;  %s451_s26 = smov [#allocation2]  }
  0x20   : > { %p371_p0 = scmp.ne.s32.totalorder %s544_s6, %s370_s22  ;;  %s375_s27 = sshll.u32 %s451_s26, 4  ;;  %s376_s27 = int_to_ptr.vmem [resolvable:$false] %s375_s27 }
  0x21   : > { %s377_s28 = scalar_lea.vmem %s376_s27, 256  ;;  %p378_p4 = scmp.lt.s32.totalorder %s544_s6, %s376_s27 }
  0x22   : > { %p373_p1 = pnand %p371_p0, %p359_p3  ;;  %p379_p12 = scmp.lt.s32.totalorder %s377_s28, %s370_s22 }
  0x24   : > { %p374_p2 = pneg %p373_p1  ;;  %p380_p11 = por %p379_p12, %p378_p4 }
  0x26   : > { %p381_p6 = pnand %p380_p11, %p374_p2 }
  0x28   : > { %384 = shalt.err (!%p381_p6)
}
  0x29   : > { %316 = dma.hbm_to_vmem [thread:$0]  (!%p540_p13), %s536_s4, 128, %s544_s6, %s138_s8  }
  0x2a   : > { %p631_p9 = scmp.lt.s32.totalorder %s449_s15, 3  ;;  %p632_p7 = scmp.ge.s32.totalorder %s449_s15, 1 }
  0x2c   : > { %p154_p0 = pnand %p632_p7, %p631_p9 }
  0x2d   : > { %s571_s29 = sand.u32 (!%p154_p0), 1, %s441_s13   ;;  %p633_p6 = scmp.ne.s32.totalorder (!%p154_p0), %s627_s23, 0 }
  0x2e   : > { %157 = sbr.rel (%p154_p0) target bundleno = 230 (0xe6), region = 32  ;;  %s301_s30 = sshll.u32 (!%p154_p0), %s571_s29, 3 }
  0x2f   : > { %s160_s5 = scalar_lea.sflag (!%p154_p0), [#allocation3], %s571_s29  ;;  %s163_s9 = scalar_lea.vmem (!%p154_p0), [#allocation2], %s301_s30 }
  0x33   : > { %428 = dma.done.wait (%p633_p6), %s160_s5, 128  }
  0x34   : > { %430 = vsyncadd (%p633_p6), %s160_s5, 4294967168  ;;  %v186_v0 = vld [vmem:[%s163_s9] sm:$0xff]  ;;  %s306_s23 = sshll.u32 %s494_s16, 7  ;;  %s185_s10 = scalar_lea.vmem [#allocation5], %s301_s30 }
  0x35   : > { %v187_v1 = vmul.f32 %v186_v0, %v186_v0  ;;  %v303_v6 = vld [vmem:[%s621_s1] ss:$0 sm:$0xff]  ;;  %s225_s11 = sshll.u32 %s185_s10, 4  ;;  %s223_s20 = scalar_lea.hbm %s623_s3, %s306_s23  ;;  %s226_s11 = int_to_ptr.vmem [resolvable:$true] %s225_s11 }
  0x36   : > { %v304_v8 = vld [vmem:[%s622_s2] ss:$0 sm:$0xff]  ;;  %s212_s22 = scalar_lea.sflag [#allocation4], %s571_s29  ;;  %s385_s26 = scalar_lea.vmem %s226_s11, 128 }
  0x37   : > { %188 = vadd.xlane.f32.xlu0 %v187_v1  ;;  %p386_p11 = scmp.ne.s32.totalorder %s226_s11, %s385_s26  ;;  %p634_p12 = scmp.ne.s32.totalorder %s628_s24, 0 }
  0x38   : > { %s452_s27 = smov [#allocation5]  }
  0x39   : > { %p387_p13 = pnand %p386_p11, %p634_p12  ;;  %s389_s28 = sshll.u32 %s452_s27, 4  ;;  %s390_s28 = int_to_ptr.vmem [resolvable:$false] %s389_s28 }
  0x3a   : > { %s391_s16 = scalar_lea.vmem %s390_s28, 256  ;;  %p392_p3 = scmp.lt.s32.totalorder %s226_s11, %s390_s28 }
  0x3b   : > { %p388_p1 = pneg %p387_p13  ;;  %p393_p5 = scmp.lt.s32.totalorder %s391_s16, %s385_s26 }
  0x3d   : > { %p394_p8 = por %p393_p5, %p392_p3 }
  0x3f   : > { %p395_p10 = pnand %p394_p8, %p388_p1 }
  0xc0   : > { %v189_v2 = vpop.xlane.xlu0 %188 }
  0xc1   : > { %v190_v3 = vmul.f32 0.0078125, %v189_v2 }
  0xc3   : > { %v191_v4 = vadd.f32 1e-05, %v190_v3 }
  0xc5   : > { %355 = vrsqrt.f32 %v191_v4 }
  0xd2   : > { %v356_v5 = vpop.eup %355 }
  0xd3   : > { %v193_v7 = vmul.f32 %v356_v5, %v186_v0 }
  0xd5   : > { %v201_v9 = vmul.f32 %v303_v6, %v193_v7 }
  0xd7   : > { %v209_v10 = vadd.f32 %v304_v8, %v201_v9 }
  0xd9   : > { %210 = vst [vmem:[%s185_s10] sm:$0xff] %v209_v10 }
  0xda   : > { %398 = shalt.err (!%p395_p10)
}
  0xdb   : > { %s399_s30 = scalar_lea.hbm %s223_s20, 128  ;;  %s403_s9 = scalar_lea.hbm %s623_s3, 256 }
  0xdc   : > { %p400_p2 = scmp.ne.s32.totalorder %s223_s20, %s399_s30  ;;  %p404_p7 = scmp.lt.s32.totalorder %s223_s20, %s623_s3 }
  0xdd   : > { %p405_p0 = scmp.lt.s32.totalorder %s403_s9, %s399_s30 }
  0xde   : > { %p401_p4 = pnand %p400_p2, %p634_p12 }
  0xdf   : > { %p406_p6 = por %p405_p0, %p404_p7 }
  0xe0   : > { %p402_p9 = pneg %p401_p4 }
  0xe2   : > { %p407_p11 = pnand %p406_p6, %p402_p9 }
  0xe4   : > { %410 = shalt.err (!%p407_p11)
}
  0xe5   : > { %311 = dma.vmem_to_hbm [thread:$0]  (%p634_p12), %s226_s11, 128, %s223_s20, %s212_s22  }
  0xe6 PF: > { %s237_s7 = sand.u32 1, %s437_s12   ;;  %p635_p13 = scmp.ne.s32.totalorder %s629_s25, 0 }
  0xe7   : > { %p636_p1 = scmp.ge.s32.totalorder %s449_s15, 2  ;;  %s238_s8 = scalar_lea.sflag [#allocation4], %s237_s7 }
  0xe9   : > { %p318_p3 = pnand %p636_p1, %p635_p13 }
  0xeb   : > { %p319_p5 = pneg %p318_p3 }
  0xed   : > { %432 = dma.done.wait (%p319_p5), %s238_s8, 128  }
  0xee   : > { %434 = vsyncadd (%p319_p5), %s238_s8, 4294967168  ;;  %p16_p8 = scmp.ge.s32.totalorder %s498_s18, 4   ;;  %s637_s12 = smov %s441_s13 }
  0xef   : > { %s638_s13 = smov %s445_s14  ;;  %s639_s14 = smov %s510_s21 }
  0xf0   : > { %s640_s15 = smov %s498_s18  ;;  %18 = sbr.rel (!%p16_p8) target bundleno = 5 (0x5), region = 77 }
  0xf5   :  { %243 = vsyncpa [#allocation3], 1 }
  0xf6   :  { %245 = vsyncpa [#allocation3 + $0x1], 1 }
  0xf7   :  { %246 = vsyncpa [#allocation4], 1 }
  0xf8   :  { %248 = vsyncpa [#allocation4 + $0x1], 1 }

</bundles_post_ra>
